<compile_context>
chip_gen: v6e
topology: v6e:2x2x1
jax: 0.10.0
libtpu: 0.0.40
codegen_flags: <defaults>
</compile_context>

<pallas_src>
import functools

import jax
import jax.numpy as jnp
from jax import lax
from jax.experimental import pallas as pl
from jax.experimental.pallas import tpu as pltpu


_MAX_TILE_P = 4096      # caps the (tp,1)/(tp,128) aux buffers at a few MiB each
_MAX_TILE_N = 16384     # caps the in-kernel lane-slab unroll at 128 adds per step


def _round_up(x, m):
    return ((x + m - 1) // m) * m


def _sublane(itemsize):
    # Native sublane granularity of the VMEM tile for this dtype
    # (8 for f32, 16 for bf16, 32 for int8/fp8).
    return max(8, 32 // itemsize)


def _layout_bytes(rows, cols, itemsize):
    sub = _sublane(itemsize)
    return _round_up(max(rows, 1), sub) * _round_up(max(cols, 1), 128) * itemsize


def _vmem_capacity_bytes():
    try:
        cap = getattr(pltpu.get_tpu_info(), "vmem_capacity_bytes", None)
        if cap:
            return int(cap)
    except Exception:
        pass
    return 128 * 1024 * 1024   # v5e/v6e default; only used as a fallback


def _choose_tiles(P, N, itemsize, target_bytes):
    """Pick (tile_p, tile_n) so the neg block is ~target_bytes of VMEM-layout bytes."""
    sub = _sublane(itemsize)
    padded_n = _round_up(N, 128)
    padded_n_bytes = padded_n * itemsize
    if sub * padded_n_bytes <= target_bytes and padded_n <= _MAX_TILE_N:
        # Full rows fit: keep N whole, grow the row tile.
        tn = N
        if P < sub:
            tp = P
        else:
            rows = (target_bytes // padded_n_bytes // sub) * sub
            tp = min(max(rows, sub), _MAX_TILE_P, (P // sub) * sub)
    else:
        # N is huge: tile the lane (N) dimension too; cap tn so the in-kernel
        # slab-add unroll stays bounded, then grow rows to hit the byte target.
        tn = min(_MAX_TILE_N, padded_n)
        if P < sub:
            tp = P
        else:
            rows = (target_bytes // (tn * itemsize) // sub) * sub
            tp = min(max(rows, sub), _MAX_TILE_P, (P // sub) * sub)
    # Guarantee >= 2 row tiles so the "parallel" axis feeds both TensorCores on
    # v7x (costs one extra ~0.35us grid step on single-TC chips -- negligible).
    if P >= 2 * sub and tp >= P:
        tp = _round_up(-(-P // 2), sub)
    return tp, tn


def _ranking_loss_kernel(pos_ref, neg_ref, *rest, has_weight, mask_rows, mask_cols,
                         num_pos, num_neg, tile_p, tile_n):
    # pos_ref: (tp, 1) f32 (margin already folded in), neg_ref: (tp, tn) HBM dtype
    # optional w_ref: (tp, 1) f32, out_ref: (tp, 1) f32, acc_ref: (tp, 128) f32 scratch.
    if has_weight:
        w_ref, out_ref, acc_ref = rest
    else:
        w_ref = None
        out_ref, acc_ref = rest

    # Hoist ALL grid queries to the top of the body: pl.program_id inside a
    # pl.when closure is not substituted by the interpret lowering path.
    i = pl.program_id(0)
    j = pl.program_id(1)
    last_j = pl.num_programs(1) - 1

    @pl.when(j == 0)
    def _init():
        acc_ref[...] = jnp.zeros_like(acc_ref)

    pos = pos_ref[...]                                            # (tp, 1) f32

    def accumulate(mask_tail):
        # hinge: max(0, neg - (pos - margin)); margin was folded into pos.
        per = jnp.maximum(neg_ref[...].astype(jnp.float32) - pos, 0.0)   # (tp, tn)
        if mask_tail:   # static flag: traced only for the last column tile
            col = lax.broadcasted_iota(jnp.int32, per.shape, 1) + j * tile_n
            per = jnp.where(col < num_neg, per, 0.0)
        n_full = tile_n // 128
        rem = tile_n - n_full * 128
        if n_full > 0:
            # Lane-aligned static slices + VPU adds: no per-step XLU reduce,
            # no masked narrow stores.
            slab = per[:, 0:128]
            for s in range(1, n_full):
                slab = slab + per[:, s * 128:(s + 1) * 128]
            acc_ref[...] += slab
        if rem > 0:
            # Only reachable when tile_n == N (single column tile): one small
            # cross-lane reduce per row tile.
            tail = jnp.sum(per[:, n_full * 128:], axis=-1, keepdims=True)  # (tp, 1)
            lane = lax.broadcasted_iota(jnp.int32, (tile_p, 128), 1)
            acc_ref[...] += jnp.where(lane == 0, tail, 0.0)

    if mask_cols:
        # Pay the iota/compare/select masking cost only on the last column tile.
        @pl.when(j != last_j)
        def _body():
            accumulate(False)

        @pl.when(j == last_j)
        def _tail():
            accumulate(True)
    else:
        accumulate(False)

    @pl.when(j == last_j)
    def _finalize():
        # One cross-lane reduce per row tile; weighting multiplies row sums
        # (tp multiplies), not per-sample values.
        row = jnp.sum(acc_ref[...], axis=-1, keepdims=True)       # (tp, 1)
        if has_weight:
            row = row * w_ref[...]
        if mask_rows:   # static flag: only traced when P % tile_p != 0
            # Garbage (possibly NaN/Inf) read from partially out-of-bounds tail
            # rows flows through maximum/sum but is neutralized by this select;
            # keep the mask AFTER the weight multiply.
            ridx = lax.broadcasted_iota(jnp.int32, row.shape, 0) + i * tile_p
            row = jnp.where(ridx < num_pos, row, 0.0)
        out_ref[...] = row


def ranking_loss(pos_scores, neg_scores, weight=None, *, margin=0.1,
                 tile_p=None, tile_n=None):
    """Pallas TPU ranking loss. Returns a 0-d float32 scalar."""
    pos_scores = jnp.asarray(pos_scores)
    neg_scores = jnp.asarray(neg_scores)
    P = pos_scores.shape[-1]
    assert neg_scores.ndim == 2 and neg_scores.shape[0] == P, "neg_scores must be (P, N)"
    N = neg_scores.shape[-1]

    if P == 0 or N == 0:
        return jnp.zeros((), jnp.float32)

    # Keep neg in its HBM dtype (bf16 stays bf16); upcast happens in-kernel.
    if not jnp.issubdtype(neg_scores.dtype, jnp.floating):
        neg_scores = neg_scores.astype(jnp.float32)

    # Fold the margin into pos (touches only P elements, effectively free):
    # in-kernel hinge becomes max(0, neg - (pos - margin)).
    pos2d = (pos_scores.astype(jnp.float32) - jnp.float32(margin)).reshape(P, 1)

    has_weight = weight is not None
    if has_weight:
        weight = jnp.asarray(weight, jnp.float32)
        assert weight.shape == (P,)
        w2d = weight.reshape(P, 1)

    itemsize = jnp.dtype(neg_scores.dtype).itemsize
    sub = _sublane(itemsize)
    vmem_cap = _vmem_capacity_bytes()
    target = max(vmem_cap // 8, 4 * 1024 * 1024)   # ~16 MiB on v5e/v6e, ~8 MiB on v7x
    auto_tp, auto_tn = _choose_tiles(P, N, itemsize, target)
    tp = auto_tp if tile_p is None else int(tile_p)
    tn = auto_tn if tile_n is None else int(tile_n)
    if not (tp == P or tp % sub == 0):
        raise ValueError(f"tile_p must equal P or be a multiple of {sub}")
    if not (tn == N or tn % 128 == 0):
        raise ValueError("tile_n must equal N or be a multiple of 128")

    num_row_tiles = pl.cdiv(P, tp)
    num_col_tiles = pl.cdiv(N, tn)
    mask_rows = (P % tp) != 0
    mask_cols = (N % tn) != 0

    kernel = functools.partial(
        _ranking_loss_kernel, has_weight=has_weight,
        mask_rows=mask_rows, mask_cols=mask_cols,
        num_pos=P, num_neg=N, tile_p=tp, tile_n=tn)

    in_specs = [
        pl.BlockSpec((tp, 1), lambda i, j: (i, 0)),    # pos - margin (resident over j)
        pl.BlockSpec((tp, tn), lambda i, j: (i, j)),   # neg (streamed)
    ]
    inputs = [pos2d, neg_scores]
    if has_weight:
        in_specs.append(pl.BlockSpec((tp, 1), lambda i, j: (i, 0)))
        inputs.append(w2d)

    # Scoped-VMEM limit from the actual footprint (double-buffered neg dominates).
    neg_blk = _layout_bytes(tp, tn, itemsize)
    aux_blk = _layout_bytes(tp, 1, 4)
    n_aux_streams = 2 + (1 if has_weight else 0)        # pos, out, [weight]
    budget = (2 * neg_blk + 2 * n_aux_streams * aux_blk
              + tp * 128 * 4                            # (tp, 128) f32 accumulator scratch
              + (4 << 20))                              # headroom
    vmem_limit = int(min(max(budget, 16 << 20), max(vmem_cap - (16 << 20), 16 << 20)))

    # Per-row weighted loss sums (masked tail rows are written as 0).
    per_row = pl.pallas_call(
        kernel,
        out_shape=jax.ShapeDtypeStruct((num_row_tiles * tp, 1), jnp.float32),
        grid_spec=pltpu.PrefetchScalarGridSpec(
            num_scalar_prefetch=0,
            grid=(num_row_tiles, num_col_tiles),
            in_specs=in_specs,
            out_specs=pl.BlockSpec((tp, 1), lambda i, j: (i, 0)),
            scratch_shapes=[pltpu.VMEM((tp, 128), jnp.float32)],
        ),
        compiler_params=pltpu.CompilerParams(
            dimension_semantics=("parallel", "arbitrary"),
            vmem_limit_bytes=vmem_limit,
        ),
    )(*inputs)

    # Tiny final reduce over <= round_up(P, tp) elements.
    return jnp.sum(per_row)


def _reference(pos, neg, weight, margin):
    per = jnp.maximum(neg.astype(jnp.float32)
                      - pos.astype(jnp.float32)[:, None] + jnp.float32(margin), 0.0)
    if weight is not None:
        per = per * weight.astype(jnp.float32)[:, None]
    return jnp.sum(per)


if __name__ == "__main__":
    key = jax.random.PRNGKey(0)
    kp, kn, kw = jax.random.split(key, 3)
    margin = 0.1

    # Case 1: f32, P not a multiple of 8, N not a multiple of 128, weighted.
    P, N = 20, 100
    pos = jax.random.normal(kp, (P,), jnp.float32)
    neg = jax.random.normal(kn, (P, N), jnp.float32)
    w = jax.random.uniform(kw, (P,), jnp.float32)

    loss_w = ranking_loss(pos, neg, w, margin=margin)
    jax.block_until_ready(loss_w)
    ref_w = _reference(pos, neg, w, margin)
    assert jnp.allclose(loss_w, ref_w, rtol=1e-5, atol=1e-5), (loss_w, ref_w)

    # Case 2: unweighted, auto tiles (exercises the has_weight=False path).
    loss_u = ranking_loss(pos, neg, None, margin=margin)
    jax.block_until_ready(loss_u)
    ref_u = _reference(pos, neg, None, margin)
    assert jnp.allclose(loss_u, ref_u, rtol=1e-5, atol=1e-5), (loss_u, ref_u)

    # Case 3: bf16 negatives, forced small tiles to exercise the multi-tile grid,
    # the inner-N accumulation, last-tile-only column masking, and row masking.
    P3, N3 = 20, 200
    pos3 = jax.random.normal(kp, (P3,), jnp.float32)
    neg3 = jax.random.normal(kn, (P3, N3), jnp.float32).astype(jnp.bfloat16)
    w3 = jax.random.uniform(kw, (P3,), jnp.float32)
    loss3 = ranking_loss(pos3, neg3, w3, margin=margin, tile_p=16, tile_n=128)
    jax.block_until_ready(loss3)
    ref3 = _reference(pos3, neg3, w3, margin)
    assert jnp.allclose(loss3, ref3, rtol=1e-4, atol=1e-4), (loss3, ref3)

    # TODO(synk): autograd (requires_grad) plumbing of the PyTorch module is not
    # implemented; this is the forward pass only.
    print("KERNEL_OK")
</pallas_src>

<mosaic_0001>
module attributes {stable_mosaic.version = 11 : i64} {
  func.func @_ranking_loss_kernel(%arg0: i32, %arg1: i32, %arg2: memref<16x1xf32, #tpu.memory_space<vmem>>, %arg3: memref<16x100xf32, #tpu.memory_space<vmem>>, %arg4: memref<16x1xf32, #tpu.memory_space<vmem>>, %arg5: memref<16x1xf32, #tpu.memory_space<vmem>>, %arg6: memref<16x128xf32, #tpu.memory_space<vmem>>) attributes {dimension_semantics = [#tpu.dimension_semantics<parallel>, #tpu.dimension_semantics<arbitrary>], iteration_bounds = array<i64: 2, 1>, scalar_prefetch = 0 : i64, scratch_operands = 1 : i64, tpu.core_type = #tpu.core_type<tc>, window_params = [{transform_indices = @transform_0, window_bounds = array<i64: 16, 1>}, {transform_indices = @transform_1, window_bounds = array<i64: 16, 100>}, {transform_indices = @transform_2, window_bounds = array<i64: 16, 1>}, {transform_indices = @transform_3, window_bounds = array<i64: 16, 1>}]} {
    %c0_i32 = arith.constant 0 : i32
    %0 = arith.cmpi eq, %arg1, %c0_i32 : i32
    %1 = arith.extui %0 : i1 to i32
    %c0_i32_0 = arith.constant 0 : i32
    %2 = arith.cmpi ne, %1, %c0_i32_0 : i32
    scf.if %2 {
      %cst_13 = arith.constant 0.000000e+00 : f32
      %24 = vector.broadcast %cst_13 : f32 to vector<16x128xf32>
      %c0_14 = arith.constant 0 : index
      %c0_15 = arith.constant 0 : index
      %25 = vector.load %arg6[%c0_14, %c0_15] : memref<16x128xf32, #tpu.memory_space<vmem>>, vector<16x128xf32>
      tpu.vector_store %arg6[%c0_14, %c0_15], %24 {strides = array<i32>} : memref<16x128xf32, #tpu.memory_space<vmem>>, vector<16x128xf32>,
    } else {
    }
    %c0 = arith.constant 0 : index
    %c0_1 = arith.constant 0 : index
    %3 = vector.load %arg2[%c0, %c0_1] : memref<16x1xf32, #tpu.memory_space<vmem>>, vector<16x1xf32>
    %c0_2 = arith.constant 0 : index
    %c0_3 = arith.constant 0 : index
    %4 = vector.load %arg3[%c0_2, %c0_3] : memref<16x100xf32, #tpu.memory_space<vmem>>, vector<16x100xf32>
    %5 = vector.broadcast %3 : vector<16x1xf32> to vector<16x100xf32>
    %6 = arith.subf %4, %5 : vector<16x100xf32>
    %cst = arith.constant 0.000000e+00 : f32
    %7 = vector.broadcast %cst : f32 to vector<16x100xf32>
    %8 = arith.maximumf %6, %7 : vector<16x100xf32>
    %cst_4 = arith.constant dense<0.000000e+00> : vector<16xf32>
    %9 = vector.multi_reduction <add>, %8, %cst_4 [1] : vector<16x100xf32> to vector<16xf32>
    %10 = vector.shape_cast %9 : vector<16xf32> to vector<16x1xf32>
    %11 = tpu.iota {dimensions = array<i32: 1>} : vector<16x128xi32>
    %c0_5 = arith.constant 0 : index
    %c0_6 = arith.constant 0 : index
    %12 = vector.load %arg6[%c0_5, %c0_6] : memref<16x128xf32, #tpu.memory_space<vmem>>, vector<16x128xf32>
    %c0_i32_7 = arith.constant 0 : i32
    %13 = vector.broadcast %c0_i32_7 : i32 to vector<16x128xi32>
    %14 = arith.cmpi eq, %11, %13 : vector<16x128xi32>
    %cst_8 = arith.constant 0.000000e+00 : f32
    %15 = vector.shape_cast %10 : vector<16x1xf32> to vector<16x1xf32>
    %16 = vector.broadcast %15 : vector<16x1xf32> to vector<16x128xf32>
    %17 = vector.broadcast %cst_8 : f32 to vector<16x128xf32>
    %18 = arith.select %14, %16, %17 : vector<16x128xi1>, vector<16x128xf32>
    %19 = arith.addf %12, %18 : vector<16x128xf32>
    %c0_9 = arith.constant 0 : index
    %c0_10 = arith.constant 0 : index
    %20 = vector.load %arg6[%c0_9, %c0_10] : memref<16x128xf32, #tpu.memory_space<vmem>>, vector<16x128xf32>
    tpu.vector_store %arg6[%c0_9, %c0_10], %19 {strides = array<i32>} : memref<16x128xf32, #tpu.memory_space<vmem>>, vector<16x128xf32>,
    %c0_i32_11 = arith.constant 0 : i32
    %21 = arith.cmpi eq, %arg1, %c0_i32_11 : i32
    %22 = arith.extui %21 : i1 to i32
    %c0_i32_12 = arith.constant 0 : i32
    %23 = arith.cmpi ne, %22, %c0_i32_12 : i32
    scf.if %23 {
      %c0_13 = arith.constant 0 : index
      %c0_14 = arith.constant 0 : index
      %24 = vector.load %arg6[%c0_13, %c0_14] : memref<16x128xf32, #tpu.memory_space<vmem>>, vector<16x128xf32>
      %cst_15 = arith.constant dense<0.000000e+00> : vector<16xf32>
      %25 = vector.multi_reduction <add>, %24, %cst_15 [1] : vector<16x128xf32> to vector<16xf32>
      %26 = vector.shape_cast %25 : vector<16xf32> to vector<16x1xf32>
      %c0_16 = arith.constant 0 : index
      %c0_17 = arith.constant 0 : index
      %27 = vector.load %arg4[%c0_16, %c0_17] : memref<16x1xf32, #tpu.memory_space<vmem>>, vector<16x1xf32>
      %28 = arith.mulf %26, %27 : vector<16x1xf32>
      %29 = tpu.iota {dimensions = array<i32: 0>} : vector<16x1xi32>
      %c16_i32 = arith.constant 16 : i32
      %30 = arith.muli %arg0, %c16_i32 : i32
      %31 = vector.broadcast %30 : i32 to vector<16x1xi32>
      %32 = arith.addi %29, %31 : vector<16x1xi32>
      %c20_i32 = arith.constant 20 : i32
      %33 = vector.broadcast %c20_i32 : i32 to vector<16x1xi32>
      %34 = arith.cmpi slt, %32, %33 : vector<16x1xi32>
      %cst_18 = arith.constant 0.000000e+00 : f32
      %35 = vector.broadcast %cst_18 : f32 to vector<16x1xf32>
      %36 = arith.select %34, %28, %35 : vector<16x1xi1>, vector<16x1xf32>
      %c0_19 = arith.constant 0 : index
      %c0_20 = arith.constant 0 : index
      %37 = vector.load %arg5[%c0_19, %c0_20] : memref<16x1xf32, #tpu.memory_space<vmem>>, vector<16x1xf32>
      tpu.vector_store %arg5[%c0_19, %c0_20], %36 {strides = array<i32>} : memref<16x1xf32, #tpu.memory_space<vmem>>, vector<16x1xf32>,
    } else {
    }
    return
  }
  func.func @transform_0(%arg0: i32, %arg1: i32) -> (i32, i32) {
    %c0_i32 = arith.constant 0 : i32
    %c0_i32_0 = arith.constant 0 : i32
    return %arg0, %c0_i32 : i32, i32
  }
  func.func @transform_1(%arg0: i32, %arg1: i32) -> (i32, i32) {
    %c0_i32 = arith.constant 0 : i32
    return %arg0, %arg1 : i32, i32
  }
  func.func @transform_2(%arg0: i32, %arg1: i32) -> (i32, i32) {
    %c0_i32 = arith.constant 0 : i32
    %c0_i32_0 = arith.constant 0 : i32
    return %arg0, %c0_i32 : i32, i32
  }
  func.func @transform_3(%arg0: i32, %arg1: i32) -> (i32, i32) {
    %c0_i32 = arith.constant 0 : i32
    %c0_i32_0 = arith.constant 0 : i32
    return %arg0, %c0_i32 : i32, i32
  }
}

</mosaic_0001>

<bundles_post_ra>
// kernel: tpu_custom_call.1
= control target key start
LH: loop header
LB: loop body
LE: loop exit
PB: predicated region body
PF: predicated region fallthrough
CT: control target
= control target key end

     0   :  { %s549_s12 = smov 0   ;;  %s551_s13 = smov 0   ;;  %s603_s0 = inlined_call_operand.vmem [shape: f32[20,1], index: 0, kind: input, shape index: {}]   ;;  %s604_s1 = inlined_call_operand.vmem [shape: f32[20,100], index: 1, kind: input, shape index: {}]   ;;  %s605_s2 = inlined_call_operand.vmem [shape: f32[20,1], index: 2, kind: input, shape index: {}]   ;;  %s606_s3 = inlined_call_operand.vmem [shape: f32[32,1], index: 3, kind: output, shape index: {}]  }
   0x1   :  { %s553_s14 = smov 0  }
   0x2 LB: > { %s25_s15 = sadd.s32 1, %s522_s13  ;;  %p466_p0 = scmp.ge.s32.totalorder %s526_s14, 1  ;;  %s526_s14 = sphi %s553_s14, %s13_s14   ;;  %s522_s13 = sphi %s551_s13, %s608_s13   ;;  %s518_s12 = sphi %s549_s12, %s607_s12  }
   0x3   : > { %p27_p1 = scmp.ge.s32.totalorder %s25_s15, 2  ;;  %p201_p2 = scmp.lt.s32.totalorder %s526_s14, 3 }
   0x5   : > { %s610_s15 = smov (%p27_p1, %s25_s15), 0  ;;  %p202_p3 = pnand %p466_p0, %p201_p2 }
   0x6   : > { %s570_s16 = sshll.u32 (!%p202_p3), %s518_s12, 1  ;;  %s475_s25 = sshll.u32 (!%p202_p3), %s518_s12, 4 }
   0x7   : > { %205 = sbr.rel (%p202_p3) target bundleno = 431 (0x1af), region = 32  ;;  %p255_p4 = scmp.lt.s32.totalorder (!%p202_p3), %s570_s16, 2 }
   0x8   : > { %p296_p5 = scmp.lt.s32.totalorder (!%p202_p3), %s570_s16, 3 }
   0xc   : > { %v528_v0 = vmov 0   ;;  %s256_s17 = scalar_select %p255_p4, %s570_s16, 2  ;;  %vm325_vm0 = vcmask 818176   ;;  %v332_v13 = vlaneseq  ;;  %v360_v20 = vstv %s475_s25 }
   0xd   : > { %503 = vset.pattern.permute.xlu0 %v528_v0  ;;  %s612_s16 = smov (!%p296_p5, %s570_s16), 3  ;;  %vm367_vm3 = vcmask 7168  }
   0xe   : > { %s574_s18 = sshll.u32 %s256_s17, 3  ;;  %v333_v14 = vand.u32 127, %v332_v13  ;;  %v357_v19 = vshrl.u32 %v332_v13, 7  ;;  %s474_s29 = sshll.u32 %s612_s16, 3 }
   0xf   : > { %s258_s21 = scalar_lea.vmem %s603_s0, %s574_s18  ;;  %s275_s24 = scalar_lea.vmem %s604_s1, %s574_s18 }
  0x10   : > { %v307_v1 = vld [vmem:[%s258_s21] sm:$0xff]  ;;  %v308_v2 = vld [vmem:[%s258_s21 + $0x8] sm:$0xff]  ;;  %vm336_vm1 = vcmp.eq.s32.totalorder %v333_v14, 0  ;;  %s289_s28 = scalar_lea.vmem %s605_s2, %s574_s18  ;;  %v361_v21 = vadd.s32 %v360_v20, %v357_v19  ;;  %v358_v22 = vadd.s32 8, %v357_v19  ;;  %s299_s5 = scalar_lea.vmem %s606_s3, %s474_s29 }
  0x11   : > { %313 = vperm.xlu0 %503, %v307_v1   ;;  %v309_v3 = vld [vmem:[%s275_s24] sm:$0xff]  ;;  %v310_v6 = vld [vmem:[%s275_s24 + $0x8] sm:$0xff] }
  0x12   : > { %v352_v23 = vld [vmem:[%s289_s28] sm:$0xff]  ;;  %vm363_vm2 = vcmp.lt.s32.totalorder %v361_v21, 20  ;;  %v362_v25 = vadd.s32 %v360_v20, %v358_v22  ;;  %v353_v27 = vld [vmem:[%s289_s28 + $0x8] sm:$0xff] }
  0x14   : > { %vm364_vm4 = vcmp.lt.s32.totalorder %v362_v25, 20 }
  0x15   : > { %318 = vperm.xlu0 %503, %v308_v2  }
  0x8c   : > { %v314_v4 = vpop.permute.xlu0 %313 }
  0x8d   : > { %v321_v5 = vsub.f32 %v309_v3, %v314_v4 }
  0x8f   : > { %v323_v7 = vmax.f32 %v321_v5, 0.0 }
  0x90   : > { %v319_v8 = vpop.permute.xlu0 %318 }
  0x91   : > { %v322_v9 = vsub.f32 %v310_v6, %v319_v8  ;;  %v326_v10 = vsel %vm325_vm0, %v323_v7, 0.0 }
  0x92   : > { %327 = vadd.xlane.f32.xlu1 %v326_v10 }
  0x93   : > { %v324_v11 = vmax.f32 %v322_v9, 0.0 }
  0x95   : > { %v329_v12 = vsel %vm325_vm0, %v324_v11, 0.0 }
  0x96   : > { %330 = vadd.xlane.f32.xlu1 %v329_v12 }
 0x11b   : > { %v328_v15 = vpop.xlane.xlu1 %327 }
 0x11c   : > { %v337_v16 = vsel %vm336_vm1, %v328_v15, 0.0 }
 0x11d   : > { %348 = vadd.xlane.f32.xlu0 %v337_v16 }
 0x11f   : > { %v331_v17 = vpop.xlane.xlu1 %330 }
 0x120   : > { %v338_v18 = vsel %vm336_vm1, %v331_v17, 0.0 }
 0x121   : > { %350 = vadd.xlane.f32.xlu1 %v338_v18 }
 0x1a6   : > { %v349_v24 = vpop.xlane.xlu0 %348 }
 0x1a7   : > { %v354_v26 = vmul.f32 %v352_v23, %v349_v24 }
 0x1a9   : > { %v365_v28 = vsel %vm363_vm2, %v354_v26, 0.0 }
 0x1aa   : > { %368 = vst.msk [vmem:[%s299_s5] sm:$0xff] %vm367_vm3, %v365_v28  ;;  %v351_v29 = vpop.xlane.xlu1 %350 }
 0x1ab   : > { %v355_v30 = vmul.f32 %v353_v27, %v351_v29 }
 0x1ad   : > { %v366_v31 = vsel %vm364_vm4, %v355_v30, 0.0 }
 0x1ae   : > { %369 = vst.msk [vmem:[%s299_s5 + $0x8] sm:$0xff] %vm367_vm3, %v366_v31 }
 0x1af PF: > { %s13_s14 = sadd.s32 1, %s526_s14   ;;  %s607_s12 = smov %s522_s13 }
 0x1b0   : > { %p10_p6 = scmp.ge.s32.totalorder %s13_s14, 4   ;;  %s608_s13 = smov %s610_s15 }
 0x1b2   :  { %12 = sbr.rel (!%p10_p6) target bundleno = 2 (0x2), region = 76 }

</bundles_post_ra>
